<compile_context>
chip_gen: v6e
topology: v6e:2x2x1
jax: 0.10.0
libtpu: 0.0.40
codegen_flags: <defaults>
</compile_context>

<pallas_src>
import math

import jax
import jax.numpy as jnp
from jax.experimental import pallas as pl
from jax.experimental.pallas import tpu as pltpu

# Hard-concrete / L0 constants (module-level constants in the original repo).
LIMIT_A = -0.1
LIMIT_B = 1.1
EPSILON = 1e-6
TEMPERATURE = 2.0 / 3.0
INV_TEMPERATURE = 1.0 / TEMPERATURE  # fold the divide into a multiply

_SINGLE_SHOT_BYTES = 1 << 20      # grid-less path only for genuinely tiny problems
_MAX_BLOCK_COLS = 2048            # lane-dense column block cap
_TILE_BYTES = 4 << 20             # per-array tile budget for the pipelined path


def _gate_and_multiply(x, w, qz, eps, out_dtype):
    """quantile_concrete -> hardtanh(0,1) -> (mask * weights) -> input * (...).
    Arithmetic in f32 (v5e VPU has no native bf16 ALUs); I/O dtype passes through."""
    x32, w32 = x.astype(jnp.float32), w.astype(jnp.float32)
    qz32, e32 = qz.astype(jnp.float32), eps.astype(jnp.float32)
    logits = (jnp.log(e32) - jnp.log(1.0 - e32) + qz32) * INV_TEMPERATURE
    y = jax.nn.sigmoid(logits)          # exact sigmoid: EUP work is hidden under DMA here
    z = y * (LIMIT_B - LIMIT_A) + LIMIT_A
    mask = jnp.clip(z, 0.0, 1.0)        # F.hardtanh(z, min_val=0, max_val=1)
    return (x32 * (mask * w32)).astype(out_dtype)


def grn_kernel(x_ref, w_ref, qz_ref, eps_ref, o_ref):
    o_ref[...] = _gate_and_multiply(
        x_ref[...], w_ref[...], qz_ref[...], eps_ref[...], o_ref.dtype)


def _working_shape(n_targets, n_regulators):
    """Lane-dense (rows, cols) view of the same row-major buffer (free reshape).
    Falls back to the natural layout when no multiple-of-128 divisor exists."""
    total = n_targets * n_regulators
    for cand in (2048, 1024, 512, 256, 128):
        if total % cand == 0:
            return total // cand, cand
    return n_targets, n_regulators


def _pick_tiles(rows, cols, itemsize, tile_bytes=_TILE_BYTES):
    """Largest (rows, cols) tile under ~tile_bytes per array; cols full-width (contiguous
    DMA) when possible, rows a multiple of 16 (covers f32 and bf16 min tiles)."""
    bc = cols if cols <= _MAX_BLOCK_COLS else _MAX_BLOCK_COLS
    rows_cap = max(16, (tile_bytes // (bc * itemsize)) // 16 * 16)
    br = rows if rows <= rows_cap else int(rows_cap)
    return int(br), int(bc)


def _vmem_capacity_bytes():
    try:
        return int(pltpu.get_tpu_info().vmem_capacity_bytes)
    except Exception:
        return 64 << 20  # conservative fallback = v7x per-TensorCore capacity


def grn_layer_forward(x, weights, qz_loga, *, eps=None, seed=None,
                      block_rows=None, block_cols=None):
    """GRN_layer.forward. Provide exactly one of:
         eps  : external Uniform(EPSILON, 1-EPSILON) noise (matches reference exactly)
         seed : int; noise is drawn in the wrapper with jax.random (portable everywhere).
    """
    assert (eps is None) != (seed is None), "pass exactly one of eps= / seed="
    n_targets, n_regulators = weights.shape
    assert x.shape == weights.shape == qz_loga.shape
    if eps is None:
        # TODO(synk): in-kernel pltpu.prng_* noise was dropped (no CPU/interpret lowering);
        # noise is drawn here with jax.random, keeping the module's sampling semantics.
        eps = jax.random.uniform(jax.random.PRNGKey(int(seed)), weights.shape,
                                 dtype=jnp.float32,
                                 minval=EPSILON, maxval=1.0 - EPSILON)
    assert eps.shape == weights.shape

    rows, cols = _working_shape(n_targets, n_regulators)
    xw, ww, qzw, epsw = (a.reshape(rows, cols) for a in (x, weights, qz_loga, eps))
    out_shape = jax.ShapeDtypeStruct((rows, cols), x.dtype)
    itemsize = jnp.dtype(x.dtype).itemsize
    total_bytes = rows * cols * itemsize
    auto_tiles = block_rows is None and block_cols is None

    # Single-shot path: tiny problem, everything resident in VMEM, no pipeline overhead.
    if auto_tiles and total_bytes <= _SINGLE_SHOT_BYTES:
        vmem = pl.BlockSpec(memory_space=pltpu.MemorySpace.VMEM)
        out = pl.pallas_call(
            grn_kernel,
            out_shape=out_shape,
            in_specs=[vmem, vmem, vmem, vmem],
            out_specs=vmem,
        )(xw, ww, qzw, epsw)
        return out.reshape(n_targets, n_regulators)

    br, bc = _pick_tiles(rows, cols, itemsize)
    if block_rows is not None:
        br = int(block_rows)
    if block_cols is not None:
        bc = int(block_cols)

    # v7x has two TensorCores: guarantee at least two parallel blocks when auto-tiling.
    if auto_tiles and pl.cdiv(rows, br) * pl.cdiv(cols, bc) < 2 and rows > 16:
        br = max(8, ((pl.cdiv(rows, 2) + 7) // 8) * 8)

    grid = (pl.cdiv(rows, br), pl.cdiv(cols, bc))

    # 5 streams (4 in + 1 out) x double buffer, plus slack; cap at device VMEM - headroom.
    cap = _vmem_capacity_bytes()
    needed = 5 * 2 * br * bc * itemsize + (8 << 20)
    vmem_limit = int(min(max(needed, 32 << 20), cap - (8 << 20)))

    spec = pl.BlockSpec((br, bc), lambda i, j: (i, j))
    out = pl.pallas_call(
        grn_kernel,
        out_shape=out_shape,
        grid=grid,
        in_specs=[spec, spec, spec, spec],
        out_specs=spec,
        compiler_params=pltpu.CompilerParams(
            dimension_semantics=("parallel", "parallel"),
            vmem_limit_bytes=vmem_limit,
        ),
    )(xw, ww, qzw, epsw)
    return out.reshape(n_targets, n_regulators)


def reference_forward(x, weights, qz_loga, eps):
    """Pure-JAX reference mirroring the PyTorch math exactly."""
    logits = (jnp.log(eps) - jnp.log(1.0 - eps) + qz_loga) * INV_TEMPERATURE
    y = jax.nn.sigmoid(logits)
    z = y * (LIMIT_B - LIMIT_A) + LIMIT_A
    mask = jnp.clip(z, 0.0, 1.0)
    return x * (mask * weights)


def build_grn_params(key, n_targets, n_regulators, droprate_init=0.5):
    """Mirror __init__ / reset_parameters: weights = W_init * prior_net, qz ~ N(mu, 0.01)."""
    k_w, k_prior, k_qz, k_x, k_eps = jax.random.split(key, 5)
    W_init = jax.random.normal(k_w, (n_targets, n_regulators), jnp.float32) * 0.1
    prior_net = (jax.random.uniform(k_prior, (n_targets, n_regulators)) < 0.3).astype(jnp.float32)
    weights = W_init * prior_net
    qz_mean = math.log(1.0 - droprate_init) - math.log(droprate_init)
    qz_loga = qz_mean + 0.01 * jax.random.normal(k_qz, (n_targets, n_regulators), jnp.float32)
    x = jax.random.normal(k_x, (n_targets, n_regulators), jnp.float32)
    eps = jax.random.uniform(k_eps, (n_targets, n_regulators), jnp.float32,
                             minval=EPSILON, maxval=1.0 - EPSILON)
    return x, weights, qz_loga, eps


if __name__ == "__main__":
    key = jax.random.PRNGKey(0)
    k1, k2, k3 = jax.random.split(key, 3)

    # Case 1: small GRN (32 x 128) with external eps -> lane-dense flatten + single-shot path.
    x1, w1, qz1, eps1 = build_grn_params(k1, 32, 128)
    out1 = jax.block_until_ready(grn_layer_forward(x1, w1, qz1, eps=eps1))
    ref1 = reference_forward(x1, w1, qz1, eps1)
    assert out1.shape == (32, 128)
    assert jnp.allclose(out1, ref1, atol=1e-5, rtol=1e-5)

    # Case 2: non-divisible GRN (200 x 384) with external eps; explicit tile override
    # exercises the tiled 2-D grid on the flattened (75, 1024) working layout,
    # including ragged edge blocks (grid = (3, 2)).
    x2, w2, qz2, eps2 = build_grn_params(k2, 200, 384)
    out2 = jax.block_until_ready(
        grn_layer_forward(x2, w2, qz2, eps=eps2, block_rows=32, block_cols=512))
    ref2 = reference_forward(x2, w2, qz2, eps2)
    assert jnp.allclose(out2, ref2, atol=1e-5, rtol=1e-5)

    # Case 3: mid-size GRN (1000 x 750), seed path (wrapper-drawn noise) with auto tiling.
    # 750000 has no multiple-of-128 divisor -> natural-layout fallback; the auto-tiler
    # forces >= 2 parallel row blocks (megacore) and sets vmem_limit from device capacity.
    # Validate exactly by regenerating the identical noise for the reference.
    x3, w3, qz3, _ = build_grn_params(k3, 1000, 750)
    seed3 = 7
    out3 = jax.block_until_ready(grn_layer_forward(x3, w3, qz3, seed=seed3))
    eps3 = jax.random.uniform(jax.random.PRNGKey(seed3), w3.shape, dtype=jnp.float32,
                              minval=EPSILON, maxval=1.0 - EPSILON)
    ref3 = reference_forward(x3, w3, qz3, eps3)
    assert jnp.allclose(out3, ref3, atol=1e-5, rtol=1e-5)

    print("KERNEL_OK")
</pallas_src>

<mosaic_0001>
module attributes {stable_mosaic.version = 11 : i64} {
  func.func @grn_kernel(%arg0: memref<2x2048xf32, #tpu.memory_space<vmem>>, %arg1: memref<2x2048xf32, #tpu.memory_space<vmem>>, %arg2: memref<2x2048xf32, #tpu.memory_space<vmem>>, %arg3: memref<2x2048xf32, #tpu.memory_space<vmem>>, %arg4: memref<2x2048xf32, #tpu.memory_space<vmem>>) attributes {dimension_semantics = [], scalar_prefetch = 0 : i64, scratch_operands = 0 : i64, tpu.core_type = #tpu.core_type<tc>} {
    %c0 = arith.constant 0 : index
    %c0_0 = arith.constant 0 : index
    %0 = vector.load %arg0[%c0, %c0_0] : memref<2x2048xf32, #tpu.memory_space<vmem>>, vector<2x2048xf32>
    %c0_1 = arith.constant 0 : index
    %c0_2 = arith.constant 0 : index
    %1 = vector.load %arg1[%c0_1, %c0_2] : memref<2x2048xf32, #tpu.memory_space<vmem>>, vector<2x2048xf32>
    %c0_3 = arith.constant 0 : index
    %c0_4 = arith.constant 0 : index
    %2 = vector.load %arg2[%c0_3, %c0_4] : memref<2x2048xf32, #tpu.memory_space<vmem>>, vector<2x2048xf32>
    %c0_5 = arith.constant 0 : index
    %c0_6 = arith.constant 0 : index
    %3 = vector.load %arg3[%c0_5, %c0_6] : memref<2x2048xf32, #tpu.memory_space<vmem>>, vector<2x2048xf32>
    %4 = math.log %3 : vector<2x2048xf32>
    %cst = arith.constant 1.000000e+00 : f32
    %5 = vector.broadcast %cst : f32 to vector<2x2048xf32>
    %6 = arith.subf %5, %3 : vector<2x2048xf32>
    %7 = math.log %6 : vector<2x2048xf32>
    %8 = arith.subf %4, %7 : vector<2x2048xf32>
    %9 = arith.addf %8, %2 : vector<2x2048xf32>
    %cst_7 = arith.constant 1.500000e+00 : f32
    %10 = vector.broadcast %cst_7 : f32 to vector<2x2048xf32>
    %11 = arith.mulf %9, %10 : vector<2x2048xf32>
    %12 = arith.negf %11 : vector<2x2048xf32>
    %13 = math.exp %12 : vector<2x2048xf32>
    %cst_8 = arith.constant 1.000000e+00 : f32
    %14 = vector.broadcast %cst_8 : f32 to vector<2x2048xf32>
    %15 = arith.addf %14, %13 : vector<2x2048xf32>
    %16 = arith.divf %14, %15 : vector<2x2048xf32>
    %cst_9 = arith.constant 1.200000e+00 : f32
    %17 = vector.broadcast %cst_9 : f32 to vector<2x2048xf32>
    %18 = arith.mulf %16, %17 : vector<2x2048xf32>
    %cst_10 = arith.constant -1.000000e-01 : f32
    %19 = vector.broadcast %cst_10 : f32 to vector<2x2048xf32>
    %20 = arith.addf %18, %19 : vector<2x2048xf32>
    %cst_11 = arith.constant 0.000000e+00 : f32
    %cst_12 = arith.constant 1.000000e+00 : f32
    %21 = vector.broadcast %cst_11 : f32 to vector<2x2048xf32>
    %22 = arith.maximumf %21, %20 : vector<2x2048xf32>
    %23 = vector.broadcast %cst_12 : f32 to vector<2x2048xf32>
    %24 = arith.minimumf %23, %22 : vector<2x2048xf32>
    %25 = arith.mulf %24, %1 : vector<2x2048xf32>
    %26 = arith.mulf %0, %25 : vector<2x2048xf32>
    %c0_13 = arith.constant 0 : index
    %c0_14 = arith.constant 0 : index
    %27 = vector.load %arg4[%c0_13, %c0_14] : memref<2x2048xf32, #tpu.memory_space<vmem>>, vector<2x2048xf32>
    tpu.vector_store %arg4[%c0_13, %c0_14], %26 {strides = array<i32>} : memref<2x2048xf32, #tpu.memory_space<vmem>>, vector<2x2048xf32>,
    return
  }
}

</mosaic_0001>

<bundles_post_ra>
// kernel: tpu_custom_call.1
= control target key start
LH: loop header
LB: loop body
LE: loop exit
PB: predicated region body
PF: predicated region fallthrough
CT: control target
= control target key end

     0   :  { %9 = vsyncpa [#allocation3], 0  ;;  %s376_s0 = inlined_call_operand.hbm [shape: f32[2,2048], index: 0, kind: input, shape index: {}]   ;;  %s377_s1 = inlined_call_operand.hbm [shape: f32[2,2048], index: 1, kind: input, shape index: {}]   ;;  %s378_s2 = inlined_call_operand.hbm [shape: f32[2,2048], index: 2, kind: input, shape index: {}]   ;;  %s379_s3 = inlined_call_operand.hbm [shape: f32[2,2048], index: 3, kind: input, shape index: {}]   ;;  %s380_s4 = inlined_call_operand.hbm [shape: f32[2,2048], index: 4, kind: output, shape index: {}]  }
   0x1   :  { %10 = vsyncpa [#allocation6], 0 }
   0x2   :  { %11 = vsyncpa [#allocation9], 0 }
   0x3   :  { %12 = vsyncpa [#allocation4], 0  ;;  %s331_s15 = smov [#allocation5]   ;;  %s332_s17 = smov [#allocation2]  }
   0x4   :  { %s29_s16 = sshll.u32 %s331_s15, 4  ;;  %s19_s18 = sshll.u32 %s332_s17, 4  ;;  %s30_s16 = int_to_ptr.vmem [resolvable:$true] %s29_s16  ;;  %s20_s18 = int_to_ptr.vmem [resolvable:$true] %s19_s18 }
   0x5   :  { %s231_s19 = scalar_lea.vmem %s30_s16, 512  ;;  %p236_p1 = scmp.lt.s32.totalorder %s30_s16, %s30_s16 }
   0x6   :  { %p232_p0 = scmp.ne.s32.totalorder %s30_s16, %s231_s19  ;;  %p237_p2 = scmp.lt.s32.totalorder %s231_s19, %s231_s19 }
   0x8   :  { %p238_p3 = por %p237_p2, %p236_p1 }
   0xa   :  { %p239_p4 = pnand %p238_p3, %p232_p0 }
   0xc   :  { %242 = shalt.err (!%p239_p4)
}
   0xd   :  { %32 = dma.hbm_to_vmem [thread:$0]  %s377_s1, 512, %s30_s16, [#allocation6]  }
   0xe   :  { %s251_s22 = scalar_lea.vmem %s20_s18, 512  ;;  %p256_p6 = scmp.lt.s32.totalorder %s20_s18, %s20_s18 }
   0xf   :  { %p252_p5 = scmp.ne.s32.totalorder %s20_s18, %s251_s22  ;;  %p257_p7 = scmp.lt.s32.totalorder %s251_s22, %s251_s22 }
  0x11   :  { %p258_p8 = por %p257_p7, %p256_p6 }
  0x13   :  { %p259_p9 = pnand %p258_p8, %p252_p5 }
  0x15   :  { %262 = shalt.err (!%p259_p9)
}
  0x16   :  { %22 = dma.hbm_to_vmem [thread:$0]  %s376_s0, 512, %s20_s18, [#allocation3]  }
  0x17   :  { %s333_s25 = smov [#allocation7]   ;;  %s334_s27 = smov [#allocation8]  }
  0x18   :  { %s39_s26 = sshll.u32 %s333_s25, 4  ;;  %s49_s28 = sshll.u32 %s334_s27, 4  ;;  %s40_s26 = int_to_ptr.vmem [resolvable:$true] %s39_s26  ;;  %s50_s28 = int_to_ptr.vmem [resolvable:$true] %s49_s28 }
  0x19   :  { %s271_s29 = scalar_lea.vmem %s40_s26, 512  ;;  %p276_p11 = scmp.lt.s32.totalorder %s40_s26, %s40_s26 }
  0x1a   :  { %p272_p10 = scmp.ne.s32.totalorder %s40_s26, %s271_s29  ;;  %p277_p12 = scmp.lt.s32.totalorder %s271_s29, %s271_s29 }
  0x1c   :  { %p278_p13 = por %p277_p12, %p276_p11 }
  0x1e   :  { %p279_p0 = pnand %p278_p13, %p272_p10 }
  0x20   :  { %282 = shalt.err (!%p279_p0)
}
  0x21   :  { %42 = dma.hbm_to_vmem [thread:$0]  %s378_s2, 512, %s40_s26, [#allocation6]  }
  0x22   :  { %s291_s5 = scalar_lea.vmem %s50_s28, 512  ;;  %p296_p2 = scmp.lt.s32.totalorder %s50_s28, %s50_s28 }
  0x23   :  { %p292_p1 = scmp.ne.s32.totalorder %s50_s28, %s291_s5  ;;  %p297_p3 = scmp.lt.s32.totalorder %s291_s5, %s291_s5 }
  0x25   :  { %p298_p4 = por %p297_p3, %p296_p2 }
  0x27   :  { %p299_p5 = pnand %p298_p4, %p292_p1 }
  0x29   :  { %302 = shalt.err (!%p299_p5)
}
  0x2a   :  { %52 = dma.hbm_to_vmem [thread:$0]  %s379_s3, 512, %s50_s28, [#allocation9]  }
  0x2b   :  { %323 = dma.done.wait [#allocation3], 512  }
  0x2c   :  { %324 = vsyncadd [#allocation3], 4294966784 }
  0x2d   :  { %325 = dma.done.wait [#allocation6], 1024  }
  0x2e   :  { %326 = vsyncadd [#allocation6], 4294966272 }
  0x2f   :  { %327 = dma.done.wait [#allocation9], 512  }
  0x30   :  { %328 = vsyncadd [#allocation9], 4294966784  ;;  %v77_v0 = vld [vmem:[#allocation8] sm:$0xff]  ;;  %v78_v2 = vld [vmem:[#allocation8 + $0x8] sm:$0xff]  ;;  %s335_s2 = smov [#allocation10]  }
  0x31   :  { %191 = vlog2.f32 %v77_v0  ;;  %v89_v1 = vsub.f32 1.0, %v77_v0  ;;  %v90_v3 = vsub.f32 1.0, %v78_v2  ;;  %v79_v4 = vld [vmem:[#allocation8 + $0x10] sm:$0xff]  ;;  %v80_v6 = vld [vmem:[#allocation8 + $0x18] sm:$0xff]  ;;  %v73_v16 = vld [vmem:[#allocation7] sm:$0xff]  ;;  %s171_s3 = sshll.u32 %s335_s2, 4  ;;  %s172_s3 = int_to_ptr.vmem [resolvable:$true] %s171_s3 }
  0x32   :  { %193 = vlog2.f32 %v78_v2  ;;  %v91_v5 = vsub.f32 1.0, %v79_v4  ;;  %v92_v7 = vsub.f32 1.0, %v80_v6  ;;  %v74_v20 = vld [vmem:[#allocation7 + $0x8] sm:$0xff]  ;;  %v75_v27 = vld [vmem:[#allocation7 + $0x10] sm:$0xff]  ;;  %v76_v33 = vld [vmem:[#allocation7 + $0x18] sm:$0xff]  ;;  %s303_s7 = scalar_lea.vmem %s172_s3, 512  ;;  %p308_p7 = scmp.lt.s32.totalorder %s172_s3, %s172_s3 }
  0x33   :  { %195 = vlog2.f32 %v89_v1  ;;  %v69_v62 = vld [vmem:[#allocation5] sm:$0xff]  ;;  %p304_p6 = scmp.ne.s32.totalorder %s172_s3, %s303_s7  ;;  %p309_p8 = scmp.lt.s32.totalorder %s303_s7, %s303_s7 }
  0x34   :  { %197 = vlog2.f32 %v90_v3  ;;  %v70_v3 = vld [vmem:[#allocation5 + $0x8] sm:$0xff] }
  0x35   :  { %199 = vlog2.f32 %v79_v4  ;;  %v65_v4 = vld [vmem:[#allocation2] sm:$0xff]  ;;  %p310_p9 = por %p309_p8, %p308_p7 }
  0x36   :  { %201 = vlog2.f32 %v91_v5 }
  0x37   :  { %203 = vlog2.f32 %v80_v6  ;;  %p311_p10 = pnand %p310_p9, %p304_p6 }
  0x38   :  { %205 = vlog2.f32 %v92_v7 }
  0x3e   :  { %v192_v8 = vpop.eup %191 }
  0x3f   :  { %v194_v9 = vpop.eup %193  ;;  %v82_v10 = vmul.f32 0.6931472, %v192_v8 }
  0x40   :  { %v196_v11 = vpop.eup %195  ;;  %v84_v12 = vmul.f32 0.6931472, %v194_v9  ;;  %v66_v9 = vld [vmem:[#allocation2 + $0x8] sm:$0xff] }
  0x41   :  { %v198_v13 = vpop.eup %197  ;;  %v94_v14 = vmul.f32 0.6931472, %v196_v11 }
  0x42   :  { %v200_v15 = vpop.eup %199  ;;  %v96_v17 = vmul.f32 0.6931472, %v198_v13 }
  0x43   :  { %v202_v18 = vpop.eup %201  ;;  %v101_v19 = vsub.f32 %v82_v10, %v94_v14  ;;  %v86_v21 = vmul.f32 0.6931472, %v200_v15  ;;  %v71_v10 = vld [vmem:[#allocation5 + $0x10] sm:$0xff] }
  0x44   :  { %v204_v22 = vpop.eup %203  ;;  %v102_v23 = vsub.f32 %v84_v12, %v96_v17  ;;  %v98_v24 = vmul.f32 0.6931472, %v202_v18  ;;  %v67_v15 = vld [vmem:[#allocation2 + $0x10] sm:$0xff] }
  0x45   :  { %v206_v25 = vpop.eup %205  ;;  %v105_v26 = vadd.f32 %v101_v19, %v73_v16  ;;  %v88_v28 = vmul.f32 0.6931472, %v204_v22  ;;  %v72_v16 = vld [vmem:[#allocation5 + $0x18] sm:$0xff] }
  0x46   :  { %v106_v29 = vadd.f32 %v102_v23, %v74_v20  ;;  %v103_v30 = vsub.f32 %v86_v21, %v98_v24  ;;  %v100_v31 = vmul.f32 0.6931472, %v206_v25  ;;  %v68_v20 = vld [vmem:[#allocation2 + $0x18] sm:$0xff] }
  0x47   :  { %v182_v32 = vmul.f32 -1.5, %v105_v26 }
  0x48   :  { %v183_v34 = vmul.f32 -1.5, %v106_v29  ;;  %v107_v35 = vadd.f32 %v103_v30, %v75_v27  ;;  %v104_v36 = vsub.f32 %v88_v28, %v100_v31 }
  0x49   :  { %v117_v37 = vmul.f32 1.442695, %v182_v32 }
  0x4a   :  { %v119_v38 = vmul.f32 1.442695, %v183_v34  ;;  %v184_v39 = vmul.f32 -1.5, %v107_v35  ;;  %v108_v40 = vadd.f32 %v104_v36, %v76_v33 }
  0x4b   :  { %207 = vpow2.f32 %v117_v37 }
  0x4c   :  { %209 = vpow2.f32 %v119_v38  ;;  %v121_v41 = vmul.f32 1.442695, %v184_v39  ;;  %v185_v42 = vmul.f32 -1.5, %v108_v40 }
  0x4e   :  { %211 = vpow2.f32 %v121_v41  ;;  %v123_v43 = vmul.f32 1.442695, %v185_v42 }
  0x50   :  { %213 = vpow2.f32 %v123_v43 }
  0x58   :  { %v208_v44 = vpop.eup %207 }
  0x59   :  { %v210_v45 = vpop.eup %209  ;;  %v125_v46 = vadd.f32 1.0, %v208_v44 }
  0x5a   :  { %v126_v47 = vadd.f32 1.0, %v210_v45 }
  0x5b   :  { %v212_v48 = vpop.eup %211  ;;  %215 = vrcp.f32 %v125_v46 }
  0x5c   :  { %217 = vrcp.f32 %v126_v47  ;;  %v127_v49 = vadd.f32 1.0, %v212_v48 }
  0x5d   :  { %v214_v50 = vpop.eup %213 }
  0x5e   :  { %219 = vrcp.f32 %v127_v49  ;;  %v128_v51 = vadd.f32 1.0, %v214_v50 }
  0x60   :  { %221 = vrcp.f32 %v128_v51 }
  0x68   :  { %v216_v52 = vpop.eup %215 }
  0x69   :  { %v218_v53 = vpop.eup %217  ;;  %v137_v54 = vmul.f32 1.2, %v216_v52 }
  0x6a   :  { %v138_v55 = vmul.f32 1.2, %v218_v53 }
  0x6b   :  { %v220_v56 = vpop.eup %219  ;;  %v141_v57 = vadd.f32 -0.1, %v137_v54 }
  0x6c   :  { %v142_v58 = vadd.f32 -0.1, %v138_v55  ;;  %v139_v59 = vmul.f32 1.2, %v220_v56 }
  0x6d   :  { %v222_v60 = vpop.eup %221  ;;  %v145_v61 = vmax.f32 %v141_v57, 0.0 }
  0x6e   :  { %v146_v63 = vmax.f32 %v142_v58, 0.0  ;;  %v143_v0 = vadd.f32 -0.1, %v139_v59  ;;  %v140_v1 = vmul.f32 1.2, %v222_v60 }
  0x6f   :  { %v149_v2 = vmin.f32 %v145_v61, 1.0 }
  0x70   :  { %v150_v5 = vmin.f32 %v146_v63, 1.0  ;;  %v147_v6 = vmax.f32 %v143_v0, 0.0  ;;  %v144_v7 = vadd.f32 -0.1, %v140_v1 }
  0x71   :  { %v153_v8 = vmul.f32 %v149_v2, %v69_v62 }
  0x72   :  { %v154_v11 = vmul.f32 %v150_v5, %v70_v3  ;;  %v151_v12 = vmin.f32 %v147_v6, 1.0  ;;  %v148_v13 = vmax.f32 %v144_v7, 0.0 }
  0x73   :  { %v157_v14 = vmul.f32 %v153_v8, %v65_v4 }
  0x74   :  { %v158_v17 = vmul.f32 %v154_v11, %v66_v9  ;;  %v155_v18 = vmul.f32 %v151_v12, %v71_v10  ;;  %v152_v19 = vmin.f32 %v148_v13, 1.0 }
  0x75   :  { %161 = vst [vmem:[#allocation10] sm:$0xff] %v157_v14 }
  0x76   :  { %162 = vst [vmem:[#allocation10 + $0x8] sm:$0xff] %v158_v17  ;;  %v159_v21 = vmul.f32 %v155_v18, %v67_v15  ;;  %v156_v22 = vmul.f32 %v152_v19, %v72_v16 }
  0x78   :  { %163 = vst [vmem:[#allocation10 + $0x10] sm:$0xff] %v159_v21  ;;  %v160_v23 = vmul.f32 %v156_v22, %v68_v20 }
  0x7a   :  { %164 = vst [vmem:[#allocation10 + $0x18] sm:$0xff] %v160_v23 }
  0x7b   :  { %314 = shalt.err (!%p311_p10)
}
  0x7c   :  { %174 = dma.vmem_to_hbm [thread:$0]  %s172_s3, 512, %s380_s4, [#allocation4]  }
  0x7d   :  { %329 = dma.done.wait [#allocation4], 512  }
  0x7e   :  { %330 = vsyncadd [#allocation4], 4294966784 }
  0x7f   :  { %178 = vsyncpa [#allocation3], 1 }
  0x80   :  { %179 = vsyncpa [#allocation6], 1 }
  0x81   :  { %180 = vsyncpa [#allocation9], 1 }
  0x82   :  { %181 = vsyncpa [#allocation4], 1 }

</bundles_post_ra>
